<compile_context>
chip_gen: v5e
topology: v5e:2x2
jax: 0.10.0
libtpu: 0.0.40
codegen_flags: <defaults>
</compile_context>

<pallas_src>
import math

import jax
import jax.numpy as jnp
from jax.experimental import pallas as pl
from jax.experimental.pallas import tpu as pltpu


def _round_up(x: int, m: int) -> int:
    return ((x + m - 1) // m) * m


def _cdiv(a: int, b: int) -> int:
    return -(-a // b)


def _device_kind() -> str:
    try:
        return jax.devices()[0].device_kind.lower()
    except Exception:
        return ""


# ----------------------------------------------------------------------------
# Kernel
# ----------------------------------------------------------------------------
def _make_qnet_kernel(n_hidden: int, compute_dtype, epilogue_dtype):
    """Kernel for one batch tile.

    refs = (state, action, W0s, W0a, b0, [Wi, bi]*, w_last_row, b_last, out)
    Weights arrive pre-cast to `compute_dtype` (MXU operands); hidden biases
    are in `epilogue_dtype`; the final bias and the output are f32.
    """

    def kernel(*refs):
        s_ref, a_ref = refs[0], refs[1]
        o_ref = refs[-1]
        p = refs[2:-1]

        # ---- layer 0 (fused concat): h = relu(s @ W0s + a @ W0a + b0) ----
        # (no-op casts when the caller already feeds bf16 state/action)
        s = s_ref[...].astype(compute_dtype)
        a = a_ref[...].astype(compute_dtype)
        acc = (jnp.dot(s, p[0][...], preferred_element_type=jnp.float32)
               + jnp.dot(a, p[1][...], preferred_element_type=jnp.float32))
        h = jnp.maximum(acc.astype(epilogue_dtype) + p[2][...], 0.0)

        # ---- remaining hidden layers ----
        idx = 3
        for _ in range(n_hidden - 1):
            w = p[idx][...]
            b = p[idx + 1][...]
            idx += 2
            acc = jnp.dot(h.astype(compute_dtype), w,
                          preferred_element_type=jnp.float32)
            h = jnp.maximum(acc.astype(epilogue_dtype) + b, 0.0)

        # ---- output layer, lane-dense: q[1, tb] = w_row · h^T + b ----
        # NT contraction (contract last dims of both operands) is the canonical
        # MXU-supported q·kᵀ layout, so no full transpose of h is materialised.
        w_row = p[idx][...]          # (1, H_last)  compute_dtype
        b_last = p[idx + 1][...]     # (1, 1)       f32
        q = jax.lax.dot_general(
            w_row, h.astype(compute_dtype),
            dimension_numbers=(((1,), (1,)), ((), ())),
            preferred_element_type=jnp.float32)       # (1, tb)
        o_ref[...] = (q + b_last).astype(o_ref.dtype)

    return kernel


# ----------------------------------------------------------------------------
# Wrapper
# ----------------------------------------------------------------------------
def qnetwork_forward(state, action, params, *, tile_b: int = 1024,
                     compute_dtype=jnp.bfloat16, epilogue_dtype=None,
                     num_cores=None):
    """QNetwork forward: params = list of (W [in, out], b [1, out]); last out=1.

    compute_dtype : MXU operand dtype. Keep bf16 on all TPU generations.
    epilogue_dtype: bias/ReLU dtype. Default: f32 on v5-class (no bf16 VALU),
                    bf16 on v6e/v7x.
    num_cores     : grid sharding hint. Default: 2 on v7x (two TensorCores),
                    else 1.
    """
    B, sd = state.shape
    Ba, ad = action.shape
    assert Ba == B
    n_layers = len(params)
    n_hidden = n_layers - 1
    assert n_hidden >= 1

    kind = _device_kind()
    if epilogue_dtype is None:
        epilogue_dtype = jnp.float32 if "v5" in kind else jnp.bfloat16
    if num_cores is None:
        num_cores = 2 if "v7" in kind else 1

    # ---- batch tiling: minimise padding, 128-lane aligned tiles when grid>1,
    # and >= num_cores steps when the batch is large enough (v7x megacore). ----
    n_steps = _cdiv(B, max(tile_b, 1))
    if num_cores > 1 and B >= num_cores * 128:
        n_steps = max(n_steps, num_cores)
    if n_steps == 1:
        tb = max(_round_up(B, 8), 8)       # full extent block; sublane aligned
    else:
        tb = _round_up(_cdiv(B, n_steps), 128)
        n_steps = _cdiv(B, tb)
        if n_steps == 1:                   # rounding collapsed to one step
            tb = max(_round_up(B, 8), 8)
    bp = tb * n_steps
    if bp != B:
        pad = bp - B
        state = jnp.pad(state, ((0, pad), (0, 0)))
        action = jnp.pad(action, ((0, pad), (0, 0)))

    # ---- kernel parameter layout: split W0 for the fused concat, transpose
    # the final [H, 1] weight into a lane row, cast to compute/epilogue dtypes.
    w0, b0 = params[0]
    kparams = [
        w0[:sd].astype(compute_dtype),                      # W0_state  (sd, H0)
        w0[sd:].astype(compute_dtype),                      # W0_action (ad, H0)
        b0.reshape(1, -1).astype(epilogue_dtype),           # (1, H0)
    ]
    for w, b in params[1:-1]:
        kparams.append(w.astype(compute_dtype))
        kparams.append(b.reshape(1, -1).astype(epilogue_dtype))
    w_last, b_last = params[-1]
    kparams.append(w_last.T.astype(compute_dtype))            # (1, H_last)
    kparams.append(b_last.reshape(1, 1).astype(jnp.float32))  # (1, 1)

    grid = (n_steps,)

    def resident(shape):
        # Full-array block with a constant index_map: DMA'd once, resident in
        # VMEM across all grid steps.  (Double-buffer allocation of these
        # blocks is accounted for in the VMEM budget below; for very wide
        # hidden layers pipeline_mode=pl.Buffered(1) would halve it.)
        return pl.BlockSpec(shape, lambda i: tuple(0 for _ in shape))

    in_specs = [
        pl.BlockSpec((tb, sd), lambda i: (i, 0)),   # state tile
        pl.BlockSpec((tb, ad), lambda i: (i, 0)),   # action tile
    ] + [resident(p.shape) for p in kparams]

    out_specs = pl.BlockSpec((1, tb), lambda i: (0, i))      # lane-dense Q^T

    # ---- VMEM budget + cost estimate ----
    def nbytes(x):
        return int(x.size) * jnp.dtype(x.dtype).itemsize

    weight_bytes = sum(nbytes(p) for p in kparams)
    dims = [sd + ad] + [w.shape[1] for w, _ in params]        # ... , 1
    max_w = max(dims)
    in_bytes = 2 * tb * (sd * jnp.dtype(state.dtype).itemsize
                         + ad * jnp.dtype(action.dtype).itemsize)
    out_bytes = 2 * tb * 4
    interm_bytes = 2 * tb * max_w * (4 + jnp.dtype(epilogue_dtype).itemsize)
    vmem_est = 2 * weight_bytes + in_bytes + out_bytes + interm_bytes + (2 << 20)
    vmem_limit = int(min(100 << 20, max(32 << 20, vmem_est)))

    flops = 2 * bp * sum(dims[i] * dims[i + 1] for i in range(len(dims) - 1))
    bytes_accessed = int(nbytes(state) + nbytes(action) + weight_bytes + bp * 4)
    cost = pl.CostEstimate(flops=int(flops), transcendentals=0,
                           bytes_accessed=bytes_accessed)

    kernel = _make_qnet_kernel(n_hidden, compute_dtype, epilogue_dtype)

    q_t = pl.pallas_call(
        kernel,
        grid=grid,
        in_specs=in_specs,
        out_specs=out_specs,
        out_shape=jax.ShapeDtypeStruct((1, bp), jnp.float32),
        compiler_params=pltpu.CompilerParams(
            dimension_semantics=("parallel",),
            vmem_limit_bytes=vmem_limit),
        cost_estimate=cost,
    )(state, action, *kparams)

    return q_t[0, :B][:, None]                      # back to (B, 1)


# ----------------------------------------------------------------------------
# Deterministic parameter init (PyTorch nn.Linear style: U(-1/sqrt(fan_in), +))
# ----------------------------------------------------------------------------
def init_qnetwork_params(key, state_dim, action_dim, hidden_units):
    dims = [state_dim + action_dim] + list(hidden_units) + [1]
    params = []
    for i in range(len(dims) - 1):
        fan_in, fan_out = dims[i], dims[i + 1]
        bound = 1.0 / math.sqrt(fan_in)
        key, kw, kb = jax.random.split(key, 3)
        w = jax.random.uniform(kw, (fan_in, fan_out), jnp.float32, -bound, bound)
        b = jax.random.uniform(kb, (1, fan_out), jnp.float32, -bound, bound)
        params.append((w, b))
    return params


# ----------------------------------------------------------------------------
# References
# ----------------------------------------------------------------------------
def qnetwork_ref(state, action, params):
    """PyTorch-semantics f32 forward."""
    h = jnp.concatenate([state, action], axis=1)
    n = len(params)
    for i, (w, b) in enumerate(params):
        h = jnp.dot(h, w, preferred_element_type=jnp.float32) + b
        if i < n - 1:
            h = jnp.maximum(h, 0.0)
    return h


def qnetwork_ref_kernel_math(state, action, params, compute_dtype=jnp.bfloat16,
                             epilogue_dtype=jnp.bfloat16):
    """Pure-JAX reference mirroring the kernel's dtype choices."""
    sd = state.shape[1]
    w0, b0 = params[0]
    acc = (jnp.dot(state.astype(compute_dtype), w0[:sd].astype(compute_dtype),
                   preferred_element_type=jnp.float32)
           + jnp.dot(action.astype(compute_dtype), w0[sd:].astype(compute_dtype),
                     preferred_element_type=jnp.float32))
    h = jnp.maximum(acc.astype(epilogue_dtype)
                    + b0.reshape(1, -1).astype(epilogue_dtype), 0.0)
    for w, b in params[1:-1]:
        acc = jnp.dot(h.astype(compute_dtype), w.astype(compute_dtype),
                      preferred_element_type=jnp.float32)
        h = jnp.maximum(acc.astype(epilogue_dtype)
                        + b.reshape(1, -1).astype(epilogue_dtype), 0.0)
    w_last, b_last = params[-1]
    q = jnp.dot(h.astype(compute_dtype), w_last.astype(compute_dtype),
                preferred_element_type=jnp.float32)
    return q + b_last.reshape(1, -1).astype(jnp.float32)


if __name__ == "__main__":
    key = jax.random.PRNGKey(0)
    key, ks, ka, kp = jax.random.split(key, 4)

    state_dim, action_dim, hidden_units = 8, 4, [32, 32]
    params = init_qnetwork_params(kp, state_dim, action_dim, hidden_units)

    # --- case 1: tiny batch (single grid step), explicit bf16 epilogue ---
    B = 2
    state = jax.random.normal(ks, (B, state_dim), jnp.float32)
    action = jax.random.normal(ka, (B, action_dim), jnp.float32)
    q = qnetwork_forward(state, action, params,
                         compute_dtype=jnp.bfloat16,
                         epilogue_dtype=jnp.bfloat16)
    q = jax.block_until_ready(q)
    assert q.shape == (B, 1), q.shape

    q_exact = qnetwork_ref_kernel_math(state, action, params,
                                       jnp.bfloat16, jnp.bfloat16)
    assert jnp.allclose(q, q_exact, atol=1e-3, rtol=1e-3), (q, q_exact)
    q_f32 = qnetwork_ref(state, action, params)
    assert jnp.allclose(q, q_f32, atol=1e-1, rtol=1e-1), (q, q_f32)

    # --- case 2: multi-step grid, 128-aligned tiles + batch padding path ---
    B2 = 300
    key, ks2, ka2 = jax.random.split(key, 3)
    state2 = jax.random.normal(ks2, (B2, state_dim), jnp.float32)
    action2 = jax.random.normal(ka2, (B2, action_dim), jnp.float32)
    q2 = qnetwork_forward(state2, action2, params, tile_b=128)
    q2 = jax.block_until_ready(q2)
    assert q2.shape == (B2, 1), q2.shape
    q2_f32 = qnetwork_ref(state2, action2, params)
    assert jnp.allclose(q2, q2_f32, atol=1e-1, rtol=1e-1), (
        float(jnp.max(jnp.abs(q2 - q2_f32))),)

    print("KERNEL_OK")
</pallas_src>

<mosaic_0001>
module attributes {stable_mosaic.version = 11 : i64} {
  func.func @kernel(%arg0: i32, %arg1: memref<8x8xf32, #tpu.memory_space<vmem>>, %arg2: memref<8x4xf32, #tpu.memory_space<vmem>>, %arg3: memref<8x32xbf16, #tpu.memory_space<vmem>>, %arg4: memref<4x32xbf16, #tpu.memory_space<vmem>>, %arg5: memref<1x32xbf16, #tpu.memory_space<vmem>>, %arg6: memref<32x32xbf16, #tpu.memory_space<vmem>>, %arg7: memref<1x32xbf16, #tpu.memory_space<vmem>>, %arg8: memref<1x32xbf16, #tpu.memory_space<vmem>>, %arg9: memref<1x1xf32, #tpu.memory_space<vmem>>, %arg10: memref<1x8xf32, #tpu.memory_space<vmem>>) attributes {dimension_semantics = [#tpu.dimension_semantics<parallel>], iteration_bounds = array<i64: 1>, scalar_prefetch = 0 : i64, scratch_operands = 0 : i64, tpu.core_type = #tpu.core_type<tc>, window_params = [{transform_indices = @transform_0, window_bounds = array<i64: 8, 8>}, {transform_indices = @transform_1, window_bounds = array<i64: 8, 4>}, {pipeline_mode = #tpu.pipeline_mode<synchronous>, transform_indices = @transform_2, window_bounds = array<i64: 8, 32>}, {pipeline_mode = #tpu.pipeline_mode<synchronous>, transform_indices = @transform_3, window_bounds = array<i64: 4, 32>}, {pipeline_mode = #tpu.pipeline_mode<synchronous>, transform_indices = @transform_4, window_bounds = array<i64: 1, 32>}, {pipeline_mode = #tpu.pipeline_mode<synchronous>, transform_indices = @transform_5, window_bounds = array<i64: 32, 32>}, {pipeline_mode = #tpu.pipeline_mode<synchronous>, transform_indices = @transform_6, window_bounds = array<i64: 1, 32>}, {pipeline_mode = #tpu.pipeline_mode<synchronous>, transform_indices = @transform_7, window_bounds = array<i64: 1, 32>}, {pipeline_mode = #tpu.pipeline_mode<synchronous>, transform_indices = @transform_8, window_bounds = array<i64: 1, 1>}, {transform_indices = @transform_9, window_bounds = array<i64: 1, 8>}]} {
    %c0 = arith.constant 0 : index
    %c0_0 = arith.constant 0 : index
    %0 = vector.load %arg1[%c0, %c0_0] : memref<8x8xf32, #tpu.memory_space<vmem>>, vector<8x8xf32>
    %1 = arith.truncf %0 : vector<8x8xf32> to vector<8x8xbf16>
    %c0_1 = arith.constant 0 : index
    %c0_2 = arith.constant 0 : index
    %2 = vector.load %arg2[%c0_1, %c0_2] : memref<8x4xf32, #tpu.memory_space<vmem>>, vector<8x4xf32>
    %3 = arith.truncf %2 : vector<8x4xf32> to vector<8x4xbf16>
    %c0_3 = arith.constant 0 : index
    %c0_4 = arith.constant 0 : index
    %4 = vector.load %arg3[%c0_3, %c0_4] : memref<8x32xbf16, #tpu.memory_space<vmem>>, vector<8x32xbf16>
    %cst = arith.constant dense<0.000000e+00> : vector<8x32xf32>
    %5 = tpu.matmul %1, %4, %cst {dimension_numbers = #tpu.dot_dimension_numbers<[1], [0], [0], [1], [0, 0, 1, 1], [], []>} : vector<8x8xbf16>, vector<8x32xbf16>, vector<8x32xf32> -> vector<8x32xf32>
    %c0_5 = arith.constant 0 : index
    %c0_6 = arith.constant 0 : index
    %6 = vector.load %arg4[%c0_5, %c0_6] : memref<4x32xbf16, #tpu.memory_space<vmem>>, vector<4x32xbf16>
    %cst_7 = arith.constant dense<0.000000e+00> : vector<8x32xf32>
    %7 = tpu.matmul %3, %6, %cst_7 {dimension_numbers = #tpu.dot_dimension_numbers<[1], [0], [0], [1], [0, 0, 1, 1], [], []>} : vector<8x4xbf16>, vector<4x32xbf16>, vector<8x32xf32> -> vector<8x32xf32>
    %8 = arith.addf %5, %7 : vector<8x32xf32>
    %9 = arith.truncf %8 : vector<8x32xf32> to vector<8x32xbf16>
    %c0_8 = arith.constant 0 : index
    %c0_9 = arith.constant 0 : index
    %10 = vector.load %arg5[%c0_8, %c0_9] : memref<1x32xbf16, #tpu.memory_space<vmem>>, vector<1x32xbf16>
    %11 = vector.broadcast %10 : vector<1x32xbf16> to vector<8x32xbf16>
    %12 = arith.addf %9, %11 : vector<8x32xbf16>
    %cst_10 = arith.constant 0.000000e+00 : bf16
    %13 = vector.broadcast %cst_10 : bf16 to vector<8x32xbf16>
    %14 = arith.maximumf %12, %13 : vector<8x32xbf16>
    %c0_11 = arith.constant 0 : index
    %c0_12 = arith.constant 0 : index
    %15 = vector.load %arg6[%c0_11, %c0_12] : memref<32x32xbf16, #tpu.memory_space<vmem>>, vector<32x32xbf16>
    %c0_13 = arith.constant 0 : index
    %c0_14 = arith.constant 0 : index
    %16 = vector.load %arg7[%c0_13, %c0_14] : memref<1x32xbf16, #tpu.memory_space<vmem>>, vector<1x32xbf16>
    %cst_15 = arith.constant dense<0.000000e+00> : vector<8x32xf32>
    %17 = tpu.matmul %14, %15, %cst_15 {dimension_numbers = #tpu.dot_dimension_numbers<[1], [0], [0], [1], [0, 0, 1, 1], [], []>} : vector<8x32xbf16>, vector<32x32xbf16>, vector<8x32xf32> -> vector<8x32xf32>
    %18 = arith.truncf %17 : vector<8x32xf32> to vector<8x32xbf16>
    %19 = vector.broadcast %16 : vector<1x32xbf16> to vector<8x32xbf16>
    %20 = arith.addf %18, %19 : vector<8x32xbf16>
    %cst_16 = arith.constant 0.000000e+00 : bf16
    %21 = vector.broadcast %cst_16 : bf16 to vector<8x32xbf16>
    %22 = arith.maximumf %20, %21 : vector<8x32xbf16>
    %c0_17 = arith.constant 0 : index
    %c0_18 = arith.constant 0 : index
    %23 = vector.load %arg8[%c0_17, %c0_18] : memref<1x32xbf16, #tpu.memory_space<vmem>>, vector<1x32xbf16>
    %c0_19 = arith.constant 0 : index
    %c0_20 = arith.constant 0 : index
    %24 = vector.load %arg9[%c0_19, %c0_20] : memref<1x1xf32, #tpu.memory_space<vmem>>, vector<1x1xf32>
    %cst_21 = arith.constant dense<0.000000e+00> : vector<1x8xf32>
    %25 = tpu.matmul %23, %22, %cst_21 {dimension_numbers = #tpu.dot_dimension_numbers<[1], [1], [0], [0], [0, 0, 1, 0], [], []>} : vector<1x32xbf16>, vector<8x32xbf16>, vector<1x8xf32> -> vector<1x8xf32>
    %26 = vector.broadcast %24 : vector<1x1xf32> to vector<1x8xf32>
    %27 = arith.addf %25, %26 : vector<1x8xf32>
    %c0_22 = arith.constant 0 : index
    %c0_23 = arith.constant 0 : index
    %28 = vector.load %arg10[%c0_22, %c0_23] : memref<1x8xf32, #tpu.memory_space<vmem>>, vector<1x8xf32>
    tpu.vector_store %arg10[%c0_22, %c0_23], %27 {strides = array<i32>} : memref<1x8xf32, #tpu.memory_space<vmem>>, vector<1x8xf32>,
    return
  }
  func.func @transform_0(%arg0: i32) -> (i32, i32) {
    %c0_i32 = arith.constant 0 : i32
    %c0_i32_0 = arith.constant 0 : i32
    return %arg0, %c0_i32 : i32, i32
  }
  func.func @transform_1(%arg0: i32) -> (i32, i32) {
    %c0_i32 = arith.constant 0 : i32
    %c0_i32_0 = arith.constant 0 : i32
    return %arg0, %c0_i32 : i32, i32
  }
  func.func @transform_2(%arg0: i32) -> (i32, i32) {
    %c0_i32 = arith.constant 0 : i32
    %c0_i32_0 = arith.constant 0 : i32
    %c0_i32_1 = arith.constant 0 : i32
    return %c0_i32, %c0_i32_0 : i32, i32
  }
  func.func @transform_3(%arg0: i32) -> (i32, i32) {
    %c0_i32 = arith.constant 0 : i32
    %c0_i32_0 = arith.constant 0 : i32
    %c0_i32_1 = arith.constant 0 : i32
    return %c0_i32, %c0_i32_0 : i32, i32
  }
  func.func @transform_4(%arg0: i32) -> (i32, i32) {
    %c0_i32 = arith.constant 0 : i32
    %c0_i32_0 = arith.constant 0 : i32
    %c0_i32_1 = arith.constant 0 : i32
    return %c0_i32, %c0_i32_0 : i32, i32
  }
  func.func @transform_5(%arg0: i32) -> (i32, i32) {
    %c0_i32 = arith.constant 0 : i32
    %c0_i32_0 = arith.constant 0 : i32
    %c0_i32_1 = arith.constant 0 : i32
    return %c0_i32, %c0_i32_0 : i32, i32
  }
  func.func @transform_6(%arg0: i32) -> (i32, i32) {
    %c0_i32 = arith.constant 0 : i32
    %c0_i32_0 = arith.constant 0 : i32
    %c0_i32_1 = arith.constant 0 : i32
    return %c0_i32, %c0_i32_0 : i32, i32
  }
  func.func @transform_7(%arg0: i32) -> (i32, i32) {
    %c0_i32 = arith.constant 0 : i32
    %c0_i32_0 = arith.constant 0 : i32
    %c0_i32_1 = arith.constant 0 : i32
    return %c0_i32, %c0_i32_0 : i32, i32
  }
  func.func @transform_8(%arg0: i32) -> (i32, i32) {
    %c0_i32 = arith.constant 0 : i32
    %c0_i32_0 = arith.constant 0 : i32
    %c0_i32_1 = arith.constant 0 : i32
    return %c0_i32, %c0_i32_0 : i32, i32
  }
  func.func @transform_9(%arg0: i32) -> (i32, i32) {
    %c0_i32 = arith.constant 0 : i32
    %c0_i32_0 = arith.constant 0 : i32
    return %c0_i32, %arg0 : i32, i32
  }
}

</mosaic_0001>

<bundles_post_ra>
// kernel: tpu_custom_call.1
= control target key start
LH: loop header
LB: loop body
LE: loop exit
PB: predicated region body
PF: predicated region fallthrough
CT: control target
= control target key end

     0   :  { %s444_s0 = inlined_call_operand.hbm [shape: f32[8,8], index: 0, kind: input, shape index: {}]   ;;  %s445_s1 = inlined_call_operand.vmem [shape: f32[8,4], index: 1, kind: input, shape index: {}]   ;;  %s446_s2 = inlined_call_operand.hbm [shape: bf16[8,32], index: 2, kind: input, shape index: {}]   ;;  %s447_s3 = inlined_call_operand.vmem [shape: bf16[4,32], index: 3, kind: input, shape index: {}]   ;;  %s448_s4 = inlined_call_operand.hbm [shape: bf16[1,32], index: 4, kind: input, shape index: {}]   ;;  %s449_s5 = inlined_call_operand.vmem [shape: bf16[32,32], index: 5, kind: input, shape index: {}]   ;;  %s450_s6 = inlined_call_operand.vmem [shape: bf16[1,32], index: 6, kind: input, shape index: {}]   ;;  %s451_s7 = inlined_call_operand.vmem [shape: bf16[1,32], index: 7, kind: input, shape index: {}]   ;;  %s452_s8 = inlined_call_operand.<no memory space> [shape: f32[1,1], index: 8, kind: input, shape index: {}]   ;;  %s453_s9 = inlined_call_operand.hbm [shape: f32[1,8], index: 9, kind: output, shape index: {}]  }
   0x1   :  { %v14_v0 = vstv %s452_s8 }
   0x2   :  { %15 = vst [vmem:[#allocation2] sm:$0x1] %v14_v0 }
   0x3   :  { %16 = vsyncpa [#allocation4], 0 }
   0x4   :  { %17 = vsyncpa [#allocation7], 0  ;;  %s37_s13 = sshll.u32 %s446_s2, 4  ;;  %s38_s13 = int_to_ptr.hbm [resolvable:$true] %s37_s13 }
   0x5   :  { %18 = vsyncpa [#allocation5], 0  ;;  %s353_s14 = smov [#allocation6]   ;;  %s24_s18 = sshll.u32 %s444_s0, 4  ;;  %s25_s18 = int_to_ptr.hbm [resolvable:$true] %s24_s18 }
   0x6   :  { %s39_s15 = sshll.u32 %s353_s14, 4  ;;  %s354_s19 = smov [#allocation3]   ;;  %s40_s15 = int_to_ptr.vmem [resolvable:$true] %s39_s15 }
   0x7   :  { %42 = dma.hbm_to_vmem [thread:$0]  %s38_s13, 64, %s40_s15, [#allocation7]  }
   0x8   :  { %s26_s8 = sshll.u32 %s354_s19, 4  ;;  %s50_s22 = sshll.u32 %s448_s4, 4  ;;  %s27_s8 = int_to_ptr.vmem [resolvable:$true] %s26_s8  ;;  %s51_s22 = int_to_ptr.hbm [resolvable:$true] %s50_s22 }
   0x9   :  { %29 = dma.hbm_to_vmem [thread:$0]  %s25_s18, 128, %s27_s8, [#allocation4]  }
   0xa   :  { %s355_s2 = smov [#allocation8]  }
   0xb   :  { %s52_s23 = sshll.u32 %s355_s2, 4  ;;  %s53_s23 = int_to_ptr.vmem [resolvable:$true] %s52_s23 }
   0xc   :  { %55 = dma.hbm_to_vmem [thread:$0]  %s51_s22, 16, %s53_s23, [#allocation7]  }
   0xd   :  { %347 = dma.done.wait [#allocation4], 128  }
   0xe   :  { %348 = vsyncadd [#allocation4], 4294967168 }
   0xf   :  { %349 = dma.done.wait [#allocation7], 80  }
  0x10   :  { %350 = vsyncadd [#allocation7], 4294967216  ;;  %vm87_vm0 = vcmask 1041408   ;;  %vm108_vm1 = vcmask 1043456   ;;  %v82_v1 = vld [vmem:[%s447_s3] sm:$0x3] }
  0x11   :  { %v81_v2 = vld [vmem:[#allocation6] sm:$0xf]  ;;  %v79_v3 = vld [vmem:[%s445_s1] sm:$0xff]  ;;  %v89_v4 = vsel %vm87_vm0, %v82_v1, 0  ;;  %vm83_vm2 = vcmask 31744   ;;  %vm104_vm3 = vcmask 64512  }
  0x12   :  { %v110_v5 = vsel %vm108_vm1, %v81_v2, 0  ;;  %v80_v6 = vpack.c.bf16 %v79_v3, %v79_v3  ;;  %v77_v7 = vld [vmem:[#allocation3] sm:$0xff]  ;;  %98 = vmatpush.bf16.msra.mxu0 %v89_v4  ;;  %v126_v11 = vld [vmem:[#allocation8] sm:$0x1]  ;;  %vm155_vm4 = vcmask 261120   ;;  %v356_v26 = vmov 0  }
  0x13   :  { %119 = vmatpush.bf16.msra.mxu1 %v110_v5  ;;  %v78_v8 = vpack.c.bf16 %v77_v7, %v77_v7  ;;  %v244_v9 = vld [vmem:[%s449_s5 + $0x8] sm:$0xff]  ;;  %v243_v10 = vld [vmem:[%s449_s5] sm:$0xff]  ;;  %v128_v12 = vpack.i.b16 %v126_v11, %v126_v11  ;;  %250 = vset.pattern.permute.xlu0 %v356_v26  ;;  %s220_s13 = sshll.u32 %s453_s9, 4  ;;  %vm211_vm5 = vcmask 57344   ;;  %s221_s13 = int_to_ptr.hbm [resolvable:$true] %s220_s13 }
  0x14   :  { %165 = vmatpush.bf16.msra.mxu2 %v244_v9  ;;  %v185_v25 = vld [vmem:[#allocation2] sm:$0x1] }
  0x15   :  { %231 = vmatmul.msk.bf16.vlgmr.msra.gmra.mxu0 %vm83_vm2, %v80_v6  ;;  %v130_v13 = vperm.slane %v128_v12, 0  ;;  %188 = vperm.xlu0 %250, %v185_v25   ;;  %v142_v27 = vld [vmem:[%s450_s6] sm:$0x1]  ;;  %s357_s6 = smov [#allocation9]  }
  0x16   :  { %232 = vmatmul.msk.bf16.vlgmr.msra.gmra.mxu1 %vm104_vm3, %v78_v8  ;;  %v174_v28 = vpack.i.b16 %v142_v27, %v142_v27  ;;  %v184_v39 = vld [vmem:[%s451_s7] sm:$0x1]  ;;  %s218_s10 = sshll.u32 %s357_s6, 4  ;;  %s219_s10 = int_to_ptr.vmem [resolvable:$true] %s218_s10 }
  0x17   :  { %v132_v18 = vunpack.c.l.bf16 %v130_v13 }
  0x18   :  { %166 = vmatpush.bf16.msra.mxu2 %v243_v10  ;;  %v176_v29 = vperm.slane %v174_v28, 0 }
  0x1a   :  { %v178_v32 = vunpack.c.l.bf16 %v176_v29 }
  0x87   :  { %v189_v40 = vpop.permute.xlu0 %188 }
  0x88   :  { %v191_v41 = vperm.slane %v189_v40, 0 }
  0x92   :  { %v100_v14 = vpop.f32.mrf.mxu0 }
  0x93   :  { %v121_v15 = vpop.f32.mrf.mxu1 }
  0x94   :  { %v122_v16 = vadd.f32 %v121_v15, %v100_v14 }
  0x96   :  { %v125_v17 = vpack.c.bf16 %v122_v16, %v122_v16 }
  0x98   :  { %v131_v19 = vunpack.c.l.bf16 %v125_v17 }
  0x9a   :  { %v133_v20 = vadd.f32 %v132_v18, %v131_v19  ;;  %v102_v21 = vpop.f32.mrf.mxu0 }
  0x9b   :  { %v123_v22 = vpop.f32.mrf.mxu1 }
  0x9c   :  { %v136_v23 = vmax.f32 %v133_v20, 0.0 }
  0x9e   :  { %v137_v24 = vpack.c.bf16 %v136_v23, %v136_v23 }
  0xa0   :  { %241 = vmatmul.msk.bf16.vlgmr.msra.gmra.mxu2 %vm155_vm4, %v137_v24 }
 0x123   :  { %v168_v30 = vpop.f32.mrf.mxu2 }
 0x124   :  { %v172_v31 = vpack.c.bf16 %v168_v30, %v168_v30 }
 0x126   :  { %v177_v33 = vunpack.c.l.bf16 %v172_v31 }
 0x128   :  { %v179_v34 = vadd.f32 %v178_v32, %v177_v33 }
 0x12a   :  { %v182_v35 = vmax.f32 %v179_v34, 0.0 }
 0x12b   :  { %v170_v36 = vpop.f32.mrf.mxu2 }
 0x12c   :  { %v183_v37 = vpack.c.bf16 %v182_v35, %v182_v35 }
 0x12e   :  { %v196_v38 = vsel %vm155_vm4, %v183_v37, 0 }
 0x12f   :  { %205 = vmatpush.bf16.xpose.msra.mxu3 %v196_v38 }
 0x136   :  { %242 = vmatmul.msk.bf16.vlgmr.msra.gmra.mxu3 %vm155_vm4, %v184_v39 }
 0x1b9   :  { %v207_v42 = vpop.f32.mrf.mxu3 }
 0x1ba   :  { %v208_v43 = vadd.f32 %v207_v42, %v191_v41 }
 0x1bc   :  { %212 = vst.msk [vmem:[#allocation9] sm:$0x1] %vm211_vm5, %v208_v43 }
 0x1bd   :  { %223 = dma.vmem_to_hbm [thread:$0]  %s219_s10, 16, %s221_s13, [#allocation5]  }
 0x1c1   :  { %v209_v44 = vpop.f32.mrf.mxu3 }
 0x1c2   :  { %351 = dma.done.wait [#allocation5], 16  }
 0x1c3   :  { %352 = vsyncadd [#allocation5], 4294967280 }
 0x1c4   :  { %228 = vsyncpa [#allocation4], 1 }
 0x1c5   :  { %229 = vsyncpa [#allocation7], 1 }
 0x1c6   :  { %230 = vsyncpa [#allocation5], 1 }

</bundles_post_ra>
